<compile_context>
chip_gen: v6e
topology: v6e:2x2x1
jax: 0.10.0
libtpu: 0.0.40
codegen_flags: <defaults>
</compile_context>

<pallas_src>
import jax
import jax.numpy as jnp
from jax.experimental import pallas as pl
from jax.experimental.pallas import tpu as pltpu

_LANE = 128


def _round_up(v, m):
    return ((v + m - 1) // m) * m


def roberta_head_kernel(x_ref, w1_ref, b1_ref, w2_ref, b2_ref, o_ref):
    # x: [TB, H] f32, w1: [H, H] bf16, b1: [1, H] f32,
    # w2: [H, Lp] bf16, b2: [1, Lp] f32, o: [TB, Lp] f32
    #
    # In-kernel bf16 cast of x: VPU work, hidden under neighbouring MXU work;
    # avoids a separate wrapper-side cast pass over x in HBM.
    x = x_ref[...].astype(jnp.bfloat16)

    # dense: x @ W1 on the MXU (bf16 in, f32 acc); bias add in f32.
    h = jnp.dot(x, w1_ref[...], preferred_element_type=jnp.float32)
    h = h + b1_ref[...]

    # tanh in bf16 on the dependent path: h was going to be truncated to bf16
    # for the second matmul anyway, so this halves the EUP passes on v6e/v7x
    # at no additional accuracy cost (v5e upcasts internally, tiny penalty).
    h = jnp.tanh(h.astype(jnp.bfloat16))

    # out_proj: h @ W2 (MXU, bf16 in / f32 acc) + bias in f32.
    y = jnp.dot(h, w2_ref[...], preferred_element_type=jnp.float32)
    o_ref[...] = (y + b2_ref[...]).astype(o_ref.dtype)


def prepare_roberta_head_params(dense_w, dense_b, out_w, out_b):
    """One-time (load-time) weight preparation.

    dense_w: [H, H], dense_b: [H], out_w: [H, L], out_b: [L]
    Returns bf16 MXU weights and f32 biases with the output projection padded
    to a lane-dense width Lp (multiple of 128). Call once and reuse across
    forwards so no per-call HBM pass is spent on casting/padding.
    """
    H = dense_w.shape[0]
    L = out_w.shape[1]
    Lp = max(_LANE, _round_up(L, _LANE))

    w1_bf = jnp.asarray(dense_w, jnp.bfloat16)
    b1 = jnp.asarray(dense_b, jnp.float32).reshape(1, H)
    w2_bf = jnp.zeros((H, Lp), jnp.bfloat16).at[:, :L].set(
        jnp.asarray(out_w, jnp.bfloat16))
    b2 = jnp.zeros((1, Lp), jnp.float32).at[0, :L].set(
        jnp.asarray(out_b, jnp.float32))

    return {"w1": w1_bf, "b1": b1, "w2": w2_bf, "b2": b2, "num_labels": L}


def roberta_classification_head(x, params, *, block_b=512):
    """x: [B, H] float32, params from prepare_roberta_head_params.

    Returns [B, num_labels] in x.dtype.
    """
    B, H = x.shape
    L = params["num_labels"]
    w1, b1, w2, b2 = params["w1"], params["b1"], params["w2"], params["b2"]
    Lp = w2.shape[1]

    # Batch tile: >=2 grid steps whenever B > 8 so v7x's two TensorCores both
    # get work via the "parallel" axis (harmless on single-TC v5e/v6e); for
    # large B use 512-row tiles to amortize the ~0.35us per-step overhead.
    # VMEM at TB=512, H=1024: ~4 MiB x + 4 MiB W1 + <1 MiB W2/out + a few MiB
    # of intermediates -- comfortably under scoped limits everywhere.
    if B <= 8:
        TB = B
    elif B <= 2 * block_b:
        TB = _round_up(pl.cdiv(B, 2), 8)
    else:
        TB = block_b
    grid = (pl.cdiv(B, TB),)

    itemsize = jnp.dtype(x.dtype).itemsize
    cost = pl.CostEstimate(
        flops=2 * B * H * (H + Lp),
        transcendentals=B * H,
        bytes_accessed=(B * H * itemsize      # x
                        + H * H * 2           # W1 bf16
                        + H * Lp * 2          # W2 bf16
                        + H * 4 + Lp * 4      # biases
                        + B * Lp * 4),        # padded output
    )

    y = pl.pallas_call(
        roberta_head_kernel,
        out_shape=jax.ShapeDtypeStruct((B, Lp), jnp.float32),
        grid=grid,
        in_specs=[
            pl.BlockSpec((TB, H), lambda i: (i, 0)),   # x: tiled over batch
            pl.BlockSpec((H, H), lambda i: (0, 0)),    # W1: VMEM-resident
            pl.BlockSpec((1, H), lambda i: (0, 0)),    # b1: VMEM-resident
            pl.BlockSpec((H, Lp), lambda i: (0, 0)),   # W2: VMEM-resident
            pl.BlockSpec((1, Lp), lambda i: (0, 0)),   # b2: VMEM-resident
        ],
        out_specs=pl.BlockSpec((TB, Lp), lambda i: (i, 0)),
        compiler_params=pltpu.CompilerParams(
            dimension_semantics=("parallel",)),
        cost_estimate=cost,
    )(x, w1, b1, w2, b2)

    # TODO(synk): on v5e consider bf16 logits / consumer-side slicing to trim
    # output writeback; kept f32 + wrapper slice for dtype parity.
    return y[:, :L].astype(x.dtype)


def _reference(x, dense_w, dense_b, out_w, out_b):
    h = jnp.tanh(x @ dense_w + dense_b)
    return h @ out_w + out_b


def _run_case(key, batch, hidden, num_labels, atol):
    kx, kw1, kb1, kw2, kb2 = jax.random.split(key, 5)
    x = jax.random.normal(kx, (batch, hidden), dtype=jnp.float32)
    dense_w = jax.random.normal(kw1, (hidden, hidden), dtype=jnp.float32) * 0.05
    dense_b = jax.random.normal(kb1, (hidden,), dtype=jnp.float32) * 0.05
    out_w = jax.random.normal(kw2, (hidden, num_labels), dtype=jnp.float32) * 0.05
    out_b = jax.random.normal(kb2, (num_labels,), dtype=jnp.float32) * 0.05

    params = prepare_roberta_head_params(dense_w, dense_b, out_w, out_b)
    out = roberta_classification_head(x, params)
    out = jax.block_until_ready(out)

    ref = _reference(x, dense_w, dense_b, out_w, out_b)
    assert out.shape == (batch, num_labels), out.shape
    # bf16 MXU inputs with f32 accumulation -> relaxed tolerance vs f32 ref.
    assert jnp.allclose(out, ref, atol=atol, rtol=atol), (
        f"mismatch vs reference at B={batch}, H={hidden}, L={num_labels}")


if __name__ == "__main__":
    key = jax.random.PRNGKey(0)
    k_small, k_big = jax.random.split(key, 2)

    # Small smoke test (full-array blocks, single grid step).
    _run_case(k_small, batch=8, hidden=32, num_labels=4, atol=1e-2)

    # Tiled path: real (8,128)-tiled blocks, 2 grid steps, partial last batch
    # tile (B not a multiple of TB), lane-dense Lp padding at realistic H.
    _run_case(k_big, batch=300, hidden=256, num_labels=3, atol=2e-2)

    print("KERNEL_OK")
</pallas_src>

<mosaic_0001>
module attributes {stable_mosaic.version = 11 : i64} {
  func.func @roberta_head_kernel(%arg0: i32, %arg1: memref<8x32xf32, #tpu.memory_space<vmem>>, %arg2: memref<32x32xbf16, #tpu.memory_space<vmem>>, %arg3: memref<1x32xf32, #tpu.memory_space<vmem>>, %arg4: memref<32x128xbf16, #tpu.memory_space<vmem>>, %arg5: memref<1x128xf32, #tpu.memory_space<vmem>>, %arg6: memref<8x128xf32, #tpu.memory_space<vmem>>) attributes {dimension_semantics = [#tpu.dimension_semantics<parallel>], iteration_bounds = array<i64: 1>, scalar_prefetch = 0 : i64, scratch_operands = 0 : i64, tpu.core_type = #tpu.core_type<tc>, window_params = [{transform_indices = @transform_0, window_bounds = array<i64: 8, 32>}, {pipeline_mode = #tpu.pipeline_mode<synchronous>, transform_indices = @transform_1, window_bounds = array<i64: 32, 32>}, {pipeline_mode = #tpu.pipeline_mode<synchronous>, transform_indices = @transform_2, window_bounds = array<i64: 1, 32>}, {pipeline_mode = #tpu.pipeline_mode<synchronous>, transform_indices = @transform_3, window_bounds = array<i64: 32, 128>}, {pipeline_mode = #tpu.pipeline_mode<synchronous>, transform_indices = @transform_4, window_bounds = array<i64: 1, 128>}, {transform_indices = @transform_5, window_bounds = array<i64: 8, 128>}]} {
    %c0 = arith.constant 0 : index
    %c0_0 = arith.constant 0 : index
    %0 = vector.load %arg1[%c0, %c0_0] : memref<8x32xf32, #tpu.memory_space<vmem>>, vector<8x32xf32>
    %1 = arith.truncf %0 : vector<8x32xf32> to vector<8x32xbf16>
    %c0_1 = arith.constant 0 : index
    %c0_2 = arith.constant 0 : index
    %2 = vector.load %arg2[%c0_1, %c0_2] : memref<32x32xbf16, #tpu.memory_space<vmem>>, vector<32x32xbf16>
    %cst = arith.constant dense<0.000000e+00> : vector<8x32xf32>
    %3 = tpu.matmul %1, %2, %cst {dimension_numbers = #tpu.dot_dimension_numbers<[1], [0], [0], [1], [0, 0, 1, 1], [], []>} : vector<8x32xbf16>, vector<32x32xbf16>, vector<8x32xf32> -> vector<8x32xf32>
    %c0_3 = arith.constant 0 : index
    %c0_4 = arith.constant 0 : index
    %4 = vector.load %arg3[%c0_3, %c0_4] : memref<1x32xf32, #tpu.memory_space<vmem>>, vector<1x32xf32>
    %5 = vector.broadcast %4 : vector<1x32xf32> to vector<8x32xf32>
    %6 = arith.addf %3, %5 : vector<8x32xf32>
    %7 = arith.truncf %6 : vector<8x32xf32> to vector<8x32xbf16>
    %8 = math.tanh %7 : vector<8x32xbf16>
    %c0_5 = arith.constant 0 : index
    %c0_6 = arith.constant 0 : index
    %9 = vector.load %arg4[%c0_5, %c0_6] : memref<32x128xbf16, #tpu.memory_space<vmem>>, vector<32x128xbf16>
    %cst_7 = arith.constant dense<0.000000e+00> : vector<8x128xf32>
    %10 = tpu.matmul %8, %9, %cst_7 {dimension_numbers = #tpu.dot_dimension_numbers<[1], [0], [0], [1], [0, 0, 1, 1], [], []>} : vector<8x32xbf16>, vector<32x128xbf16>, vector<8x128xf32> -> vector<8x128xf32>
    %c0_8 = arith.constant 0 : index
    %c0_9 = arith.constant 0 : index
    %11 = vector.load %arg5[%c0_8, %c0_9] : memref<1x128xf32, #tpu.memory_space<vmem>>, vector<1x128xf32>
    %12 = vector.broadcast %11 : vector<1x128xf32> to vector<8x128xf32>
    %13 = arith.addf %10, %12 : vector<8x128xf32>
    %c0_10 = arith.constant 0 : index
    %c0_11 = arith.constant 0 : index
    %14 = vector.load %arg6[%c0_10, %c0_11] : memref<8x128xf32, #tpu.memory_space<vmem>>, vector<8x128xf32>
    tpu.vector_store %arg6[%c0_10, %c0_11], %13 {strides = array<i32>} : memref<8x128xf32, #tpu.memory_space<vmem>>, vector<8x128xf32>,
    return
  }
  func.func @transform_0(%arg0: i32) -> (i32, i32) {
    %c0_i32 = arith.constant 0 : i32
    %c0_i32_0 = arith.constant 0 : i32
    return %arg0, %c0_i32 : i32, i32
  }
  func.func @transform_1(%arg0: i32) -> (i32, i32) {
    %c0_i32 = arith.constant 0 : i32
    %c0_i32_0 = arith.constant 0 : i32
    %c0_i32_1 = arith.constant 0 : i32
    return %c0_i32, %c0_i32_0 : i32, i32
  }
  func.func @transform_2(%arg0: i32) -> (i32, i32) {
    %c0_i32 = arith.constant 0 : i32
    %c0_i32_0 = arith.constant 0 : i32
    %c0_i32_1 = arith.constant 0 : i32
    return %c0_i32, %c0_i32_0 : i32, i32
  }
  func.func @transform_3(%arg0: i32) -> (i32, i32) {
    %c0_i32 = arith.constant 0 : i32
    %c0_i32_0 = arith.constant 0 : i32
    %c0_i32_1 = arith.constant 0 : i32
    return %c0_i32, %c0_i32_0 : i32, i32
  }
  func.func @transform_4(%arg0: i32) -> (i32, i32) {
    %c0_i32 = arith.constant 0 : i32
    %c0_i32_0 = arith.constant 0 : i32
    %c0_i32_1 = arith.constant 0 : i32
    return %c0_i32, %c0_i32_0 : i32, i32
  }
  func.func @transform_5(%arg0: i32) -> (i32, i32) {
    %c0_i32 = arith.constant 0 : i32
    %c0_i32_0 = arith.constant 0 : i32
    return %arg0, %c0_i32 : i32, i32
  }
}

</mosaic_0001>

<bundles_post_ra>
// kernel: tpu_custom_call.1
= control target key start
LH: loop header
LB: loop body
LE: loop exit
PB: predicated region body
PF: predicated region fallthrough
CT: control target
= control target key end

     0   :  { %10 = vsyncpa [#allocation3], 0  ;;  %s403_s0 = inlined_call_operand.hbm [shape: f32[8,32], index: 0, kind: input, shape index: {}]   ;;  %s404_s1 = inlined_call_operand.hbm [shape: bf16[32,32], index: 1, kind: input, shape index: {}]   ;;  %s405_s2 = inlined_call_operand.vmem [shape: f32[1,32], index: 2, kind: input, shape index: {}]   ;;  %s406_s3 = inlined_call_operand.hbm [shape: bf16[32,128], index: 3, kind: input, shape index: {}]   ;;  %s407_s4 = inlined_call_operand.vmem [shape: f32[1,128], index: 4, kind: input, shape index: {}]   ;;  %s408_s5 = inlined_call_operand.hbm [shape: f32[8,128], index: 5, kind: output, shape index: {}]  }
   0x1   :  { %11 = vsyncpa [#allocation6], 0 }
   0x2   :  { %12 = vsyncpa [#allocation4], 0  ;;  %s345_s18 = smov [#allocation5]  }
   0x3   :  { %s28_s19 = sshll.u32 %s345_s18, 4  ;;  %s29_s19 = int_to_ptr.vmem [resolvable:$true] %s28_s19 }
   0x4   :  { %s267_s20 = scalar_lea.vmem %s29_s19, 256  ;;  %p272_p1 = scmp.lt.s32.totalorder %s29_s19, %s29_s19 }
   0x5   :  { %p268_p0 = scmp.ne.s32.totalorder %s29_s19, %s267_s20  ;;  %p273_p2 = scmp.lt.s32.totalorder %s267_s20, %s267_s20 }
   0x7   :  { %p274_p3 = por %p273_p2, %p272_p1 }
   0x9   :  { %p275_p4 = pnand %p274_p3, %p268_p0 }
   0xb   :  { %278 = shalt.err (!%p275_p4)
}
   0xc   :  { %s346_s21 = smov 64   ;;  %s347_s22 = smov 4  }
   0xd   :  { %34 = dma.hbm_to_vmem [thread:$0]  %s404_s1, 256, %s29_s19, [#allocation6], %s346_s21, %s346_s21, %s347_s22  }
   0xe   :  { %s348_s25 = smov [#allocation2]   ;;  %s349_s27 = smov [#allocation7]  }
   0xf   :  { %s19_s26 = sshll.u32 %s348_s25, 4  ;;  %s42_s28 = sshll.u32 %s349_s27, 4  ;;  %s20_s26 = int_to_ptr.vmem [resolvable:$true] %s19_s26  ;;  %s43_s28 = int_to_ptr.vmem [resolvable:$true] %s42_s28 }
  0x10   :  { %s287_s29 = scalar_lea.vmem %s20_s26, 128  ;;  %p292_p6 = scmp.lt.s32.totalorder %s20_s26, %s20_s26 }
  0x11   :  { %p288_p5 = scmp.ne.s32.totalorder %s20_s26, %s287_s29  ;;  %p293_p7 = scmp.lt.s32.totalorder %s287_s29, %s287_s29 }
  0x13   :  { %p294_p8 = por %p293_p7, %p292_p6 }
  0x15   :  { %p295_p9 = pnand %p294_p8, %p288_p5 }
  0x17   :  { %298 = shalt.err (!%p295_p9)
}
  0x18   :  { %22 = dma.hbm_to_vmem [thread:$0]  %s403_s0, 128, %s20_s26, [#allocation3]  }
  0x19   :  { %s307_s7 = scalar_lea.vmem %s43_s28, 256  ;;  %p312_p11 = scmp.lt.s32.totalorder %s43_s28, %s43_s28 }
  0x1a   :  { %p308_p10 = scmp.ne.s32.totalorder %s43_s28, %s307_s7  ;;  %p313_p12 = scmp.lt.s32.totalorder %s307_s7, %s307_s7 }
  0x1c   :  { %p314_p13 = por %p313_p12, %p312_p11 }
  0x1e   :  { %p315_p0 = pnand %p314_p13, %p308_p10 }
  0x20   :  { %318 = shalt.err (!%p315_p0)
}
  0x21   :  { %48 = dma.hbm_to_vmem [thread:$0]  %s406_s3, 256, %s43_s28, [#allocation6], %s346_s21, %s346_s21, %s347_s22  }
  0x22   :  { %339 = dma.done.wait [#allocation3], 128  }
  0x23   :  { %340 = vsyncadd [#allocation3], 4294967168 }
  0x24   :  { %341 = dma.done.wait [#allocation6], 512  }
  0x25   :  { %342 = vsyncadd [#allocation6], 4294966784  ;;  %v350_v0 = vmov 0.0   ;;  %vm351_vm0 = vmmov 0   ;;  %v253_v1 = vld [vmem:[#allocation5 + $0x8] sm:$0xff]   ;;  %v254_v2 = vld [vmem:[#allocation5] sm:$0xff]  }
  0x26   :  { %229 = vmatprep.subr.bf16.mxu0 %v350_v0  ;;  %233 = vmatprep.mubr.msk.bf16.mxu0 %vm351_vm0, %v350_v0  ;;  %v61_v3 = vld [vmem:[#allocation2] sm:$0xff]  ;;  %vm86_vm1 = vcmask 261120   ;;  %v256_v6 = vld [vmem:[#allocation7] sm:$0xff]   ;;  %s352_s11 = smov [#allocation8]  }
  0x27   :  { %237 = vmatprep.subr.bf16.mxu1 %v350_v0  ;;  %241 = vmatprep.mubr.msk.bf16.mxu1 %vm351_vm0, %v350_v0  ;;  %v62_v4 = vpack.c.bf16 %v61_v3, %v61_v3  ;;  %v255_v5 = vld [vmem:[#allocation7 + $0x8] sm:$0xff]   ;;  %s205_s12 = sshll.u32 %s352_s11, 4  ;;  %s206_s12 = int_to_ptr.vmem [resolvable:$true] %s205_s12 }
  0x28   :  { %230 = vmatpush3.bf16.msra.mxu0 %v253_v1  ;;  %238 = vmatpush3.bf16.msra.mxu1 %v255_v5  ;;  %v215_v7 = vld [vmem:[%s405_s2] ss:$0 sm:$0xff]  ;;  %s319_s2 = scalar_lea.vmem %s206_s12, 128  ;;  %p324_p2 = scmp.lt.s32.totalorder %s206_s12, %s206_s12 }
  0x29   :  { %231 = vmatprep.subr.bf16.mxu0 %v350_v0  ;;  %239 = vmatprep.subr.bf16.mxu1 %v350_v0  ;;  %v219_v15 = vld [vmem:[%s407_s4] ss:$0 sm:$0xff]  ;;  %p320_p1 = scmp.ne.s32.totalorder %s206_s12, %s319_s2  ;;  %p325_p3 = scmp.lt.s32.totalorder %s319_s2, %s319_s2 }
  0x2b   :  { %p326_p4 = por %p325_p3, %p324_p2 }
  0x2c   :  { %232 = vmatpush3.bf16.msra.mxu0 %v254_v2  ;;  %240 = vmatpush3.bf16.msra.mxu1 %v256_v6 }
  0x2d   :  { %p327_p5 = pnand %p326_p4, %p320_p1 }
  0x2f   :  { %234 = vmatmul.mubr.msk.bf16.vlgmr.msra.gmra.mxu0 %vm86_vm1, %v62_v4 }
  0xef   :  { %v124_v8 = vpop.f32.mrf.mxu0 }
  0xf0   :  { %v125_v9 = vadd.f32 %v215_v7, %v124_v8 }
  0xf1   :  { %v235_v10 = vpop.f32.mrf.mxu0 }
  0xf2   :  { %v130_v11 = vpack.c.bf16 %v125_v9, %v125_v9 }
  0xf3   :  { %v127_v12 = vpop.f32.mrf.mxu0 }
  0xf4   :  { %257 = vtanh.bf16 %v130_v11 }
  0xf5   :  { %v236_v13 = vpop.f32.mrf.mxu0 }
 0x102   :  { %v258_v14 = vpop.eup %257 }
 0x103   :  { %242 = vmatmul.mubr.msk.bf16.vlgmr.msra.gmra.mxu1 %vm86_vm1, %v258_v14 }
 0x1c3   :  { %v192_v16 = vpop.f32.mrf.mxu1 }
 0x1c4   :  { %v193_v17 = vadd.f32 %v219_v15, %v192_v16 }
 0x1c5   :  { %v243_v18 = vpop.f32.mrf.mxu1 }
 0x1c6   :  { %198 = vst [vmem:[#allocation8] sm:$0xff] %v193_v17 }
 0x1c7   :  { %v195_v19 = vpop.f32.mrf.mxu1 }
 0x1c8   :  { %330 = shalt.err (!%p327_p5)
}
 0x1c9   :  { %208 = dma.vmem_to_hbm [thread:$0]  %s206_s12, 128, %s408_s5, [#allocation4]   ;;  %v244_v20 = vpop.f32.mrf.mxu1 }
 0x1ca   :  { %343 = dma.done.wait [#allocation4], 128  }
 0x1cb   :  { %344 = vsyncadd [#allocation4], 4294967168 }
 0x1cc   :  { %212 = vsyncpa [#allocation3], 1 }
 0x1cd   :  { %213 = vsyncpa [#allocation6], 1 }
 0x1ce   :  { %214 = vsyncpa [#allocation4], 1 }

</bundles_post_ra>
